<compile_context>
chip_gen: v7x
topology: tpu7x:2x2x1
jax: 0.10.0
libtpu: 0.0.40
codegen_flags: <defaults>
</compile_context>

<pallas_src>
import functools

import jax
import jax.numpy as jnp
from jax import lax
from jax.experimental import pallas as pl
from jax.experimental.pallas import tpu as pltpu

_LANE = 128


def _cdiv(a, b):
    return -(-a // b)


def _round_up(a, b):
    return _cdiv(a, b) * b


def _cmi_kernel(w1_ref, b1_ref, w2_ref, x_ref, o_ref, *, f_in, hidden, cr):
    """One batch block.

    w1_ref: (hidden*f_in,) f32 SMEM -- 0.5 * torch layer-1 weight, flattened
    b1_ref: (hidden,)      f32 SMEM -- 0.5 * layer-1 bias
    w2_ref: (hidden,)      f32 SMEM -- 0.5 * layer-2 weight
    x_ref : (f_in, TR, 128) VMEM    -- batch on (sublane, lane), feature-major
    o_ref : (TR, 128) f32 VMEM      -- lane-dense output slab
    """
    # Hoist every SMEM scalar into a Python local once per grid step.
    w1s = [[w1_ref[j * f_in + k] for k in range(f_in)] for j in range(hidden)]
    b1s = [b1_ref[j] for j in range(hidden)]
    w2s = [w2_ref[j] for j in range(hidden)]
    acc0 = w2s[0]
    for j in range(1, hidden):
        acc0 = acc0 + w2s[j]          # == 0.5 * sum(w2): the tanh-form constant

    tr = o_ref.shape[0]
    n_chunks = tr // cr               # wrapper guarantees cr divides TR

    def chunk(c, carry):
        r0 = pl.multiple_of(c * cr, cr)
        xs = [x_ref[k, pl.ds(r0, cr), :].astype(jnp.float32) for k in range(f_in)]
        acc = jnp.full((cr, _LANE), acc0, dtype=jnp.float32)
        for j in range(hidden):
            h = xs[0] * w1s[j][0] + b1s[j]
            for k in range(1, f_in):
                h = h + xs[k] * w1s[j][k]
            acc = acc + jnp.tanh(h) * w2s[j]      # sigmoid via tanh: 1 EUP push
        o_ref[pl.ds(r0, cr), :] = acc
        return carry

    lax.fori_loop(0, n_chunks, chunk, 0)


def cmi_estimator_forward_fm(x_fm, w1, b1, w2, *, tm_max=524288):
    """Fast path: x_fm is FEATURE-MAJOR with shape (f_in, N). Returns (N, 1) f32."""
    f_in, n = x_fm.shape
    hidden = w1.shape[0]

    n_rg = _cdiv(n, _LANE)            # 128-row groups
    n_pad = n_rg * _LANE
    if n_pad != n:
        # Only copy on this path; producers with N % 128 == 0 pay zero relayout.
        x_fm = jnp.pad(x_fm, ((0, 0), (0, n_pad - n)))
    x3 = x_fm.reshape(f_in, n_rg, _LANE)   # contiguous reshape: free

    # Batch tile: big enough to amortize the per-step pipeline overhead, small
    # enough for v7x's 64 MiB VMEM, and >= ~8 grid steps on large batches so the
    # "parallel" axis shards across both v7x TensorCores.
    tr_cap = max(32, (tm_max // _LANE) // 32 * 32)
    if n_rg <= 32:
        tr = n_rg                      # single block; equals full dim (legal)
    else:
        tr = min(tr_cap, _round_up(_cdiv(n_rg, 8), 32))
    cr = 32 if tr % 32 == 0 else tr    # in-kernel chunk size (row groups)
    grid = (pl.cdiv(n_rg, tr),)

    # Host-folded tanh form of the sigmoid (see kernel docstring).
    w1h = (0.5 * w1).astype(jnp.float32).reshape(hidden * f_in)
    b1h = (0.5 * b1).astype(jnp.float32)
    w2h = (0.5 * w2).astype(jnp.float32).reshape(hidden)

    x_bytes = f_in * tr * _LANE * x3.dtype.itemsize
    o_bytes = tr * _LANE * 4
    vmem_limit = min(2 * (x_bytes + o_bytes) + (8 << 20), 64 << 20)

    out = pl.pallas_call(
        functools.partial(_cmi_kernel, f_in=f_in, hidden=hidden, cr=cr),
        out_shape=jax.ShapeDtypeStruct((n_rg, _LANE), jnp.float32),
        grid_spec=pltpu.PrefetchScalarGridSpec(
            num_scalar_prefetch=0,
            grid=grid,
            in_specs=[
                pl.BlockSpec(memory_space=pltpu.MemorySpace.SMEM),    # folded w1
                pl.BlockSpec(memory_space=pltpu.MemorySpace.SMEM),    # folded b1
                pl.BlockSpec(memory_space=pltpu.MemorySpace.SMEM),    # folded w2
                pl.BlockSpec((f_in, tr, _LANE), lambda i: (0, i, 0)), # batch-tiled x
            ],
            out_specs=pl.BlockSpec((tr, _LANE), lambda i: (i, 0)),
        ),
        compiler_params=pltpu.CompilerParams(
            dimension_semantics=("parallel",),
            vmem_limit_bytes=int(vmem_limit)),
    )(w1h, b1h, w2h, x3)

    return out.reshape(n_pad)[:n].reshape(n, 1)


def cmi_estimator_forward(x, w1, b1, w2, *, tm_max=524288):
    """Module-compatible entry: x is (N, f_in) sample-major, as in PyTorch.

    The transpose below is one XLA copy (~24 B/row); producers that can supply
    feature-major (f_in, N) data should call cmi_estimator_forward_fm directly.
    """
    return cmi_estimator_forward_fm(x.T, w1, b1, w2, tm_max=tm_max)


def reference_forward(x, w1, b1, w2):
    return jax.nn.sigmoid(x @ w1.T + b1[None, :]) @ w2.T


if __name__ == "__main__":
    z_size = 1
    f_in = z_size + 2          # 3
    hidden = 8

    key = jax.random.PRNGKey(0)
    kx, kx2, kw1, kb1, kw2 = jax.random.split(key, 5)

    # PyTorch Linear default init: U(-1/sqrt(fan_in), 1/sqrt(fan_in)).
    bound1 = 1.0 / jnp.sqrt(jnp.float32(f_in))
    w1 = jax.random.uniform(kw1, (hidden, f_in), jnp.float32, -bound1, bound1)
    b1 = jax.random.uniform(kb1, (hidden,), jnp.float32, -bound1, bound1)
    bound2 = 1.0 / jnp.sqrt(jnp.float32(hidden))
    w2 = jax.random.uniform(kw2, (1, hidden), jnp.float32, -bound2, bound2)

    # 1) Small sample-major batch: exactly the module's forward signature.
    batch = 16
    x = jax.random.normal(kx, (batch, f_in), jnp.float32)
    out = jax.block_until_ready(cmi_estimator_forward(x, w1, b1, w2))
    ref = reference_forward(x, w1, b1, w2)
    assert out.shape == (batch, 1)
    assert jnp.allclose(out, ref, atol=1e-5, rtol=1e-5)

    # 2) Larger feature-major batch: exercises the multi-step grid, the
    #    in-kernel chunk loop and the ragged last block (no wrapper relayout
    #    on this path beyond the %128 tail pad).
    batch2 = 8200
    x2_fm = jax.random.normal(kx2, (f_in, batch2), jnp.float32)
    out2 = jax.block_until_ready(cmi_estimator_forward_fm(x2_fm, w1, b1, w2))
    ref2 = reference_forward(x2_fm.T, w1, b1, w2)
    assert out2.shape == (batch2, 1)
    assert jnp.allclose(out2, ref2, atol=1e-5, rtol=1e-5)

    print("KERNEL_OK")
</pallas_src>

<mosaic_0001>
module attributes {stable_mosaic.version = 11 : i64} {
  func.func @_cmi_kernel(%arg0: i32, %arg1: memref<24xf32, #tpu.memory_space<smem>>, %arg2: memref<8xf32, #tpu.memory_space<smem>>, %arg3: memref<8xf32, #tpu.memory_space<smem>>, %arg4: memref<3x1x128xf32, #tpu.memory_space<vmem>>, %arg5: memref<1x128xf32, #tpu.memory_space<vmem>>) attributes {dimension_semantics = [#tpu.dimension_semantics<parallel>], iteration_bounds = array<i64: 1>, scalar_prefetch = 0 : i64, scratch_operands = 0 : i64, tpu.core_type = #tpu.core_type<tc>, window_params = [{transform_indices = @transform_0, window_bounds = array<i64: 24>}, {transform_indices = @transform_1, window_bounds = array<i64: 8>}, {transform_indices = @transform_2, window_bounds = array<i64: 8>}, {transform_indices = @transform_3, window_bounds = array<i64: 3, 1, 128>}, {transform_indices = @transform_4, window_bounds = array<i64: 1, 128>}]} {
    %c0 = arith.constant 0 : index
    %0 = memref.load %arg1[%c0] : memref<24xf32, #tpu.memory_space<smem>>
    %c1 = arith.constant 1 : index
    %1 = memref.load %arg1[%c1] : memref<24xf32, #tpu.memory_space<smem>>
    %c2 = arith.constant 2 : index
    %2 = memref.load %arg1[%c2] : memref<24xf32, #tpu.memory_space<smem>>
    %c3 = arith.constant 3 : index
    %3 = memref.load %arg1[%c3] : memref<24xf32, #tpu.memory_space<smem>>
    %c4 = arith.constant 4 : index
    %4 = memref.load %arg1[%c4] : memref<24xf32, #tpu.memory_space<smem>>
    %c5 = arith.constant 5 : index
    %5 = memref.load %arg1[%c5] : memref<24xf32, #tpu.memory_space<smem>>
    %c6 = arith.constant 6 : index
    %6 = memref.load %arg1[%c6] : memref<24xf32, #tpu.memory_space<smem>>
    %c7 = arith.constant 7 : index
    %7 = memref.load %arg1[%c7] : memref<24xf32, #tpu.memory_space<smem>>
    %c8 = arith.constant 8 : index
    %8 = memref.load %arg1[%c8] : memref<24xf32, #tpu.memory_space<smem>>
    %c9 = arith.constant 9 : index
    %9 = memref.load %arg1[%c9] : memref<24xf32, #tpu.memory_space<smem>>
    %c10 = arith.constant 10 : index
    %10 = memref.load %arg1[%c10] : memref<24xf32, #tpu.memory_space<smem>>
    %c11 = arith.constant 11 : index
    %11 = memref.load %arg1[%c11] : memref<24xf32, #tpu.memory_space<smem>>
    %c12 = arith.constant 12 : index
    %12 = memref.load %arg1[%c12] : memref<24xf32, #tpu.memory_space<smem>>
    %c13 = arith.constant 13 : index
    %13 = memref.load %arg1[%c13] : memref<24xf32, #tpu.memory_space<smem>>
    %c14 = arith.constant 14 : index
    %14 = memref.load %arg1[%c14] : memref<24xf32, #tpu.memory_space<smem>>
    %c15 = arith.constant 15 : index
    %15 = memref.load %arg1[%c15] : memref<24xf32, #tpu.memory_space<smem>>
    %c16 = arith.constant 16 : index
    %16 = memref.load %arg1[%c16] : memref<24xf32, #tpu.memory_space<smem>>
    %c17 = arith.constant 17 : index
    %17 = memref.load %arg1[%c17] : memref<24xf32, #tpu.memory_space<smem>>
    %c18 = arith.constant 18 : index
    %18 = memref.load %arg1[%c18] : memref<24xf32, #tpu.memory_space<smem>>
    %c19 = arith.constant 19 : index
    %19 = memref.load %arg1[%c19] : memref<24xf32, #tpu.memory_space<smem>>
    %c20 = arith.constant 20 : index
    %20 = memref.load %arg1[%c20] : memref<24xf32, #tpu.memory_space<smem>>
    %c21 = arith.constant 21 : index
    %21 = memref.load %arg1[%c21] : memref<24xf32, #tpu.memory_space<smem>>
    %c22 = arith.constant 22 : index
    %22 = memref.load %arg1[%c22] : memref<24xf32, #tpu.memory_space<smem>>
    %c23 = arith.constant 23 : index
    %23 = memref.load %arg1[%c23] : memref<24xf32, #tpu.memory_space<smem>>
    %c0_0 = arith.constant 0 : index
    %24 = memref.load %arg2[%c0_0] : memref<8xf32, #tpu.memory_space<smem>>
    %c1_1 = arith.constant 1 : index
    %25 = memref.load %arg2[%c1_1] : memref<8xf32, #tpu.memory_space<smem>>
    %c2_2 = arith.constant 2 : index
    %26 = memref.load %arg2[%c2_2] : memref<8xf32, #tpu.memory_space<smem>>
    %c3_3 = arith.constant 3 : index
    %27 = memref.load %arg2[%c3_3] : memref<8xf32, #tpu.memory_space<smem>>
    %c4_4 = arith.constant 4 : index
    %28 = memref.load %arg2[%c4_4] : memref<8xf32, #tpu.memory_space<smem>>
    %c5_5 = arith.constant 5 : index
    %29 = memref.load %arg2[%c5_5] : memref<8xf32, #tpu.memory_space<smem>>
    %c6_6 = arith.constant 6 : index
    %30 = memref.load %arg2[%c6_6] : memref<8xf32, #tpu.memory_space<smem>>
    %c7_7 = arith.constant 7 : index
    %31 = memref.load %arg2[%c7_7] : memref<8xf32, #tpu.memory_space<smem>>
    %c0_8 = arith.constant 0 : index
    %32 = memref.load %arg3[%c0_8] : memref<8xf32, #tpu.memory_space<smem>>
    %c1_9 = arith.constant 1 : index
    %33 = memref.load %arg3[%c1_9] : memref<8xf32, #tpu.memory_space<smem>>
    %c2_10 = arith.constant 2 : index
    %34 = memref.load %arg3[%c2_10] : memref<8xf32, #tpu.memory_space<smem>>
    %c3_11 = arith.constant 3 : index
    %35 = memref.load %arg3[%c3_11] : memref<8xf32, #tpu.memory_space<smem>>
    %c4_12 = arith.constant 4 : index
    %36 = memref.load %arg3[%c4_12] : memref<8xf32, #tpu.memory_space<smem>>
    %c5_13 = arith.constant 5 : index
    %37 = memref.load %arg3[%c5_13] : memref<8xf32, #tpu.memory_space<smem>>
    %c6_14 = arith.constant 6 : index
    %38 = memref.load %arg3[%c6_14] : memref<8xf32, #tpu.memory_space<smem>>
    %c7_15 = arith.constant 7 : index
    %39 = memref.load %arg3[%c7_15] : memref<8xf32, #tpu.memory_space<smem>>
    %40 = arith.addf %32, %33 : f32
    %41 = arith.addf %40, %34 : f32
    %42 = arith.addf %41, %35 : f32
    %43 = arith.addf %42, %36 : f32
    %44 = arith.addf %43, %37 : f32
    %45 = arith.addf %44, %38 : f32
    %46 = arith.addf %45, %39 : f32
    %c0_i32 = arith.constant 0 : i32
    %c1_i32 = arith.constant 1 : i32
    %47 = arith.muli %c0_i32, %c1_i32 : i32
    %48 = tpu.assume_multiple %47, 1 : i32
    %c0_16 = arith.constant 0 : index
    %49 = arith.index_cast %48 : i32 to index
    %c0_17 = arith.constant 0 : index
    %50 = vector.load %arg4[%c0_16, %49, %c0_17] : memref<3x1x128xf32, #tpu.memory_space<vmem>>, vector<1x1x128xf32>
    %51 = vector.shape_cast %50 : vector<1x1x128xf32> to vector<1x128xf32>
    %c1_18 = arith.constant 1 : index
    %52 = arith.index_cast %48 : i32 to index
    %c0_19 = arith.constant 0 : index
    %53 = vector.load %arg4[%c1_18, %52, %c0_19] : memref<3x1x128xf32, #tpu.memory_space<vmem>>, vector<1x1x128xf32>
    %54 = vector.shape_cast %53 : vector<1x1x128xf32> to vector<1x128xf32>
    %c2_20 = arith.constant 2 : index
    %55 = arith.index_cast %48 : i32 to index
    %c0_21 = arith.constant 0 : index
    %56 = vector.load %arg4[%c2_20, %55, %c0_21] : memref<3x1x128xf32, #tpu.memory_space<vmem>>, vector<1x1x128xf32>
    %57 = vector.shape_cast %56 : vector<1x1x128xf32> to vector<1x128xf32>
    %58 = vector.broadcast %46 : f32 to vector<1x128xf32>
    %59 = vector.broadcast %0 : f32 to vector<1x128xf32>
    %60 = arith.mulf %51, %59 : vector<1x128xf32>
    %61 = vector.broadcast %24 : f32 to vector<1x128xf32>
    %62 = arith.addf %60, %61 : vector<1x128xf32>
    %63 = vector.broadcast %1 : f32 to vector<1x128xf32>
    %64 = arith.mulf %54, %63 : vector<1x128xf32>
    %65 = arith.addf %62, %64 : vector<1x128xf32>
    %66 = vector.broadcast %2 : f32 to vector<1x128xf32>
    %67 = arith.mulf %57, %66 : vector<1x128xf32>
    %68 = arith.addf %65, %67 : vector<1x128xf32>
    %69 = math.tanh %68 : vector<1x128xf32>
    %70 = vector.broadcast %32 : f32 to vector<1x128xf32>
    %71 = arith.mulf %69, %70 : vector<1x128xf32>
    %72 = arith.addf %58, %71 : vector<1x128xf32>
    %73 = vector.broadcast %3 : f32 to vector<1x128xf32>
    %74 = arith.mulf %51, %73 : vector<1x128xf32>
    %75 = vector.broadcast %25 : f32 to vector<1x128xf32>
    %76 = arith.addf %74, %75 : vector<1x128xf32>
    %77 = vector.broadcast %4 : f32 to vector<1x128xf32>
    %78 = arith.mulf %54, %77 : vector<1x128xf32>
    %79 = arith.addf %76, %78 : vector<1x128xf32>
    %80 = vector.broadcast %5 : f32 to vector<1x128xf32>
    %81 = arith.mulf %57, %80 : vector<1x128xf32>
    %82 = arith.addf %79, %81 : vector<1x128xf32>
    %83 = math.tanh %82 : vector<1x128xf32>
    %84 = vector.broadcast %33 : f32 to vector<1x128xf32>
    %85 = arith.mulf %83, %84 : vector<1x128xf32>
    %86 = arith.addf %72, %85 : vector<1x128xf32>
    %87 = vector.broadcast %6 : f32 to vector<1x128xf32>
    %88 = arith.mulf %51, %87 : vector<1x128xf32>
    %89 = vector.broadcast %26 : f32 to vector<1x128xf32>
    %90 = arith.addf %88, %89 : vector<1x128xf32>
    %91 = vector.broadcast %7 : f32 to vector<1x128xf32>
    %92 = arith.mulf %54, %91 : vector<1x128xf32>
    %93 = arith.addf %90, %92 : vector<1x128xf32>
    %94 = vector.broadcast %8 : f32 to vector<1x128xf32>
    %95 = arith.mulf %57, %94 : vector<1x128xf32>
    %96 = arith.addf %93, %95 : vector<1x128xf32>
    %97 = math.tanh %96 : vector<1x128xf32>
    %98 = vector.broadcast %34 : f32 to vector<1x128xf32>
    %99 = arith.mulf %97, %98 : vector<1x128xf32>
    %100 = arith.addf %86, %99 : vector<1x128xf32>
    %101 = vector.broadcast %9 : f32 to vector<1x128xf32>
    %102 = arith.mulf %51, %101 : vector<1x128xf32>
    %103 = vector.broadcast %27 : f32 to vector<1x128xf32>
    %104 = arith.addf %102, %103 : vector<1x128xf32>
    %105 = vector.broadcast %10 : f32 to vector<1x128xf32>
    %106 = arith.mulf %54, %105 : vector<1x128xf32>
    %107 = arith.addf %104, %106 : vector<1x128xf32>
    %108 = vector.broadcast %11 : f32 to vector<1x128xf32>
    %109 = arith.mulf %57, %108 : vector<1x128xf32>
    %110 = arith.addf %107, %109 : vector<1x128xf32>
    %111 = math.tanh %110 : vector<1x128xf32>
    %112 = vector.broadcast %35 : f32 to vector<1x128xf32>
    %113 = arith.mulf %111, %112 : vector<1x128xf32>
    %114 = arith.addf %100, %113 : vector<1x128xf32>
    %115 = vector.broadcast %12 : f32 to vector<1x128xf32>
    %116 = arith.mulf %51, %115 : vector<1x128xf32>
    %117 = vector.broadcast %28 : f32 to vector<1x128xf32>
    %118 = arith.addf %116, %117 : vector<1x128xf32>
    %119 = vector.broadcast %13 : f32 to vector<1x128xf32>
    %120 = arith.mulf %54, %119 : vector<1x128xf32>
    %121 = arith.addf %118, %120 : vector<1x128xf32>
    %122 = vector.broadcast %14 : f32 to vector<1x128xf32>
    %123 = arith.mulf %57, %122 : vector<1x128xf32>
    %124 = arith.addf %121, %123 : vector<1x128xf32>
    %125 = math.tanh %124 : vector<1x128xf32>
    %126 = vector.broadcast %36 : f32 to vector<1x128xf32>
    %127 = arith.mulf %125, %126 : vector<1x128xf32>
    %128 = arith.addf %114, %127 : vector<1x128xf32>
    %129 = vector.broadcast %15 : f32 to vector<1x128xf32>
    %130 = arith.mulf %51, %129 : vector<1x128xf32>
    %131 = vector.broadcast %29 : f32 to vector<1x128xf32>
    %132 = arith.addf %130, %131 : vector<1x128xf32>
    %133 = vector.broadcast %16 : f32 to vector<1x128xf32>
    %134 = arith.mulf %54, %133 : vector<1x128xf32>
    %135 = arith.addf %132, %134 : vector<1x128xf32>
    %136 = vector.broadcast %17 : f32 to vector<1x128xf32>
    %137 = arith.mulf %57, %136 : vector<1x128xf32>
    %138 = arith.addf %135, %137 : vector<1x128xf32>
    %139 = math.tanh %138 : vector<1x128xf32>
    %140 = vector.broadcast %37 : f32 to vector<1x128xf32>
    %141 = arith.mulf %139, %140 : vector<1x128xf32>
    %142 = arith.addf %128, %141 : vector<1x128xf32>
    %143 = vector.broadcast %18 : f32 to vector<1x128xf32>
    %144 = arith.mulf %51, %143 : vector<1x128xf32>
    %145 = vector.broadcast %30 : f32 to vector<1x128xf32>
    %146 = arith.addf %144, %145 : vector<1x128xf32>
    %147 = vector.broadcast %19 : f32 to vector<1x128xf32>
    %148 = arith.mulf %54, %147 : vector<1x128xf32>
    %149 = arith.addf %146, %148 : vector<1x128xf32>
    %150 = vector.broadcast %20 : f32 to vector<1x128xf32>
    %151 = arith.mulf %57, %150 : vector<1x128xf32>
    %152 = arith.addf %149, %151 : vector<1x128xf32>
    %153 = math.tanh %152 : vector<1x128xf32>
    %154 = vector.broadcast %38 : f32 to vector<1x128xf32>
    %155 = arith.mulf %153, %154 : vector<1x128xf32>
    %156 = arith.addf %142, %155 : vector<1x128xf32>
    %157 = vector.broadcast %21 : f32 to vector<1x128xf32>
    %158 = arith.mulf %51, %157 : vector<1x128xf32>
    %159 = vector.broadcast %31 : f32 to vector<1x128xf32>
    %160 = arith.addf %158, %159 : vector<1x128xf32>
    %161 = vector.broadcast %22 : f32 to vector<1x128xf32>
    %162 = arith.mulf %54, %161 : vector<1x128xf32>
    %163 = arith.addf %160, %162 : vector<1x128xf32>
    %164 = vector.broadcast %23 : f32 to vector<1x128xf32>
    %165 = arith.mulf %57, %164 : vector<1x128xf32>
    %166 = arith.addf %163, %165 : vector<1x128xf32>
    %167 = math.tanh %166 : vector<1x128xf32>
    %168 = vector.broadcast %39 : f32 to vector<1x128xf32>
    %169 = arith.mulf %167, %168 : vector<1x128xf32>
    %170 = arith.addf %156, %169 : vector<1x128xf32>
    %171 = arith.index_cast %48 : i32 to index
    %c0_22 = arith.constant 0 : index
    %172 = vector.load %arg5[%171, %c0_22] : memref<1x128xf32, #tpu.memory_space<vmem>>, vector<1x128xf32>
    tpu.vector_store %arg5[%171, %c0_22], %170 {strides = array<i32>} : memref<1x128xf32, #tpu.memory_space<vmem>>, vector<1x128xf32>,
    %c1_i32_23 = arith.constant 1 : i32
    return
  }
  func.func @transform_0(%arg0: i32) -> i32 {
    %c0_i32 = arith.constant 0 : i32
    %c0_i32_0 = arith.constant 0 : i32
    return %c0_i32 : i32
  }
  func.func @transform_1(%arg0: i32) -> i32 {
    %c0_i32 = arith.constant 0 : i32
    %c0_i32_0 = arith.constant 0 : i32
    return %c0_i32 : i32
  }
  func.func @transform_2(%arg0: i32) -> i32 {
    %c0_i32 = arith.constant 0 : i32
    %c0_i32_0 = arith.constant 0 : i32
    return %c0_i32 : i32
  }
  func.func @transform_3(%arg0: i32) -> (i32, i32, i32) {
    %c0_i32 = arith.constant 0 : i32
    %c0_i32_0 = arith.constant 0 : i32
    %c0_i32_1 = arith.constant 0 : i32
    return %c0_i32, %arg0, %c0_i32_0 : i32, i32, i32
  }
  func.func @transform_4(%arg0: i32) -> (i32, i32) {
    %c0_i32 = arith.constant 0 : i32
    %c0_i32_0 = arith.constant 0 : i32
    return %arg0, %c0_i32 : i32, i32
  }
}

</mosaic_0001>

<bundles_post_ra>
// kernel: tpu_custom_call.1
= control target key start
LH: loop header
LB: loop body
LE: loop exit
PB: predicated region body
PF: predicated region fallthrough
CT: control target
= control target key end

     0   :  { %9 = vsyncpa [#allocation4], 0  ;;  %s595_s0 = inlined_call_operand.hbm [shape: f32[24], index: 0, kind: input, shape index: {}]   ;;  %s596_s1 = inlined_call_operand.vmem [shape: f32[8], index: 1, kind: input, shape index: {}]   ;;  %s597_s2 = inlined_call_operand.vmem [shape: f32[8], index: 2, kind: input, shape index: {}]   ;;  %s598_s3 = inlined_call_operand.vmem [shape: f32[3,1,128], index: 3, kind: input, shape index: {}]   ;;  %s599_s4 = inlined_call_operand.hbm [shape: f32[1,128], index: 4, kind: output, shape index: {}]  }
   0x1   :  { %10 = vsyncpa [#allocation5], 0 }
   0x2   :  { %11 = vsyncpa [#allocation8], 0 }
   0x3   :  { %12 = vsyncpa [#allocation3], 0  ;;  %s27_s17 = sshll.u32 %s596_s1, 4  ;;  %s299_s20 = scalar_lea.hbm %s595_s0, 16  ;;  %s28_s17 = int_to_ptr.vmem [resolvable:$true] %s27_s17 }
   0x4   :  { %p300_p0 = scmp.ne.s32.totalorder %s595_s0, %s299_s20  ;;  %p303_p1 = scmp.lt.u32.totalorder %s299_s20, %s595_s0 }
   0x6   :  { %p305_p2 = pnand %p303_p1, %p300_p0 }
   0x8   :  { %308 = shalt.err (!%p305_p2)
}
   0x9   :  { %s363_s25 = smov [#allocation2]   ;;  %s309_s1 = scalar_lea.vmem %s28_s17, 16 }
   0xa   :  { %20 = dma.hbm_to_smem %s595_s0, 16, %s363_s25, [#allocation4]  }
   0xb   :  { %p310_p3 = scmp.ne.s32.totalorder %s28_s17, %s309_s1  ;;  %p314_p4 = scmp.lt.s32.totalorder %s28_s17, %s28_s17 }
   0xc   :  { %p315_p5 = scmp.lt.s32.totalorder %s309_s1, %s309_s1 }
   0xe   :  { %p316_p6 = por %p315_p5, %p314_p4 }
  0x10   :  { %p317_p7 = pnand %p316_p6, %p310_p3 }
  0x12   :  { %320 = shalt.err (!%p317_p7)
}
  0x13   :  { %s364_s28 = smov [#allocation6]   ;;  %s37_s5 = sshll.u32 %s597_s2, 4  ;;  %s38_s5 = int_to_ptr.vmem [resolvable:$true] %s37_s5 }
  0x14   :  { %30 = dma.vmem_to_smem %s28_s17, 16, %s364_s28, [#allocation5]  }
  0x15   :  { %s321_s6 = scalar_lea.vmem %s38_s5, 16  ;;  %p326_p9 = scmp.lt.s32.totalorder %s38_s5, %s38_s5 }
  0x16   :  { %p322_p8 = scmp.ne.s32.totalorder %s38_s5, %s321_s6  ;;  %p327_p10 = scmp.lt.s32.totalorder %s321_s6, %s321_s6 }
  0x18   :  { %p328_p11 = por %p327_p10, %p326_p9 }
  0x1a   :  { %p329_p12 = pnand %p328_p11, %p322_p8 }
  0x1c   :  { %332 = shalt.err (!%p329_p12)
}
  0x1d   :  { %s365_s0 = smov [#allocation7]  }
  0x1e   :  { %40 = dma.vmem_to_smem %s38_s5, 16, %s365_s0, [#allocation8]  }
  0x1f   :  { %355 = dma.done.wait [#allocation4], 16  }
  0x20   :  { %356 = vsyncadd [#allocation4], 4294967280 }
  0x21   :  { %357 = dma.done.wait [#allocation5], 16  }
  0x22   :  { %358 = vsyncadd [#allocation5], 4294967280 }
  0x23   :  { %359 = dma.done.wait [#allocation8], 16  }
  0x24   :  { %360 = vsyncadd [#allocation8], 4294967280 }
  0x25   :  { %52 = sfence }
  0x26   :  { %s410_s7 = sld [smem:[#allocation2]]  ;;  %s412_s2 = sld [smem:[#allocation2 + $0x1]]  ;;  %v437_v0 = vld [vmem:[%s598_s3] sm:$0x1]  ;;  %v442_v1 = vld [vmem:[%s598_s3 + $0x1] sm:$0x1] }
  0x27   :  { %s414_s8 = sld [smem:[#allocation2 + $0x2]]  ;;  %s416_s9 = sld [smem:[#allocation2 + $0x3]]  ;;  %v451_v2 = vld [vmem:[%s598_s3 + $0x2] sm:$0x1] }
  0x28   :  { %s418_s10 = sld [smem:[#allocation2 + $0x4]]  ;;  %s420_s11 = sld [smem:[#allocation2 + $0x5]] }
  0x29   :  { %s422_s12 = sld [smem:[#allocation2 + $0x6]]  ;;  %s424_s13 = sld [smem:[#allocation2 + $0x7]] }
  0x2a   :  { %s426_s14 = sld [smem:[#allocation2 + $0x8]]  ;;  %s428_s15 = sld [smem:[#allocation2 + $0x9]] }
  0x2b   :  { %s430_s16 = sld [smem:[#allocation2 + $0xa]]  ;;  %s432_s17 = sld [smem:[#allocation2 + $0xb]] }
  0x2c   :  { %s444_s22 = sld [smem:[#allocation2 + $0xc]]  ;;  %s446_s23 = sld [smem:[#allocation2 + $0xd]]  ;;  %v108_v3 = vstv %s410_s7  ;;  %v112_v4 = vstv %s412_s2 }
  0x2d   :  { %s453_s26 = sld [smem:[#allocation2 + $0xe]]  ;;  %s455_s27 = sld [smem:[#allocation2 + $0xf]]  ;;  %v115_v5 = vstv %s414_s8  ;;  %v122_v6 = vstv %s416_s9  ;;  %v109_v9 = vmul.f32 %v108_v3, %v437_v0  ;;  %v113_v10 = vmul.f32 %v442_v1, %v112_v4 }
  0x2e   :  { %s461_s1 = sld [smem:[#allocation2 + $0x10]]  ;;  %s463_s28 = sld [smem:[#allocation2 + $0x11]]  ;;  %v126_v7 = vstv %s418_s10  ;;  %v129_v8 = vstv %s420_s11  ;;  %v478_v11 = vmul.f32 %v451_v2, %v115_v5  ;;  %v123_v12 = vmul.f32 %v122_v6, %v437_v0 }
  0x2f   :  { %s467_s3 = sld [smem:[#allocation2 + $0x12]]  ;;  %s469_s29 = sld [smem:[#allocation2 + $0x13]]  ;;  %v127_v13 = vmul.f32 %v442_v1, %v126_v7  ;;  %v483_v14 = vmul.f32 %v451_v2, %v129_v8  ;;  %v136_v15 = vstv %s422_s12  ;;  %v140_v16 = vstv %s424_s13 }
  0x30   :  { %s471_s30 = sld [smem:[#allocation2 + $0x14]]  ;;  %s473_s5 = sld [smem:[#allocation2 + $0x15]]  ;;  %v143_v17 = vstv %s426_s14  ;;  %v150_v18 = vstv %s428_s15  ;;  %v137_v25 = vmul.f32 %v136_v15, %v437_v0  ;;  %v141_v26 = vmul.f32 %v442_v1, %v140_v16 }
  0x31   :  { %s487_s6 = sld [smem:[#allocation6]]  ;;  %s489_s0 = sld [smem:[#allocation6 + $0x1]]  ;;  %v154_v19 = vstv %s430_s16  ;;  %v157_v20 = vstv %s432_s17  ;;  %v144_v29 = vmul.f32 %v451_v2, %v143_v17  ;;  %v151_v30 = vmul.f32 %v150_v18, %v437_v0 }
  0x32   :  { %s495_s7 = sld [smem:[#allocation6 + $0x2]]  ;;  %s497_s2 = sld [smem:[#allocation6 + $0x3]]  ;;  %v164_v21 = vstv %s444_s22  ;;  %v168_v22 = vstv %s446_s23  ;;  %v155_v31 = vmul.f32 %v442_v1, %v154_v19  ;;  %v158_v32 = vmul.f32 %v451_v2, %v157_v20 }
  0x33   :  { %v171_v23 = vstv %s453_s26  ;;  %v178_v24 = vstv %s455_s27  ;;  %s503_s8 = sld [smem:[#allocation6 + $0x4]]  ;;  %s505_s9 = sld [smem:[#allocation6 + $0x5]]  ;;  %v165_v33 = vmul.f32 %v164_v21, %v437_v0  ;;  %v169_v34 = vmul.f32 %v442_v1, %v168_v22 }
  0x34   :  { %v182_v27 = vstv %s461_s1  ;;  %v185_v28 = vstv %s463_s28  ;;  %s511_s10 = sld [smem:[#allocation2 + $0x16]]  ;;  %s513_s11 = sld [smem:[#allocation2 + $0x17]]  ;;  %v172_v35 = vmul.f32 %v451_v2, %v171_v23  ;;  %v179_v36 = vmul.f32 %v178_v24, %v437_v0 }
  0x35   :  { %s519_s12 = sld [smem:[#allocation7]]  ;;  %s521_s13 = sld [smem:[#allocation7 + $0x1]]  ;;  %v183_v37 = vmul.f32 %v442_v1, %v182_v27  ;;  %v186_v38 = vmul.f32 %v451_v2, %v185_v28  ;;  %v192_v39 = vstv %s467_s3  ;;  %v196_v40 = vstv %s469_s29 }
  0x36   :  { %s527_s14 = sld [smem:[#allocation6 + $0x6]]  ;;  %s529_s15 = sld [smem:[#allocation7 + $0x2]]  ;;  %v199_v43 = vstv %s471_s30  ;;  %v206_v44 = vstv %s473_s5  ;;  %v193_v59 = vmul.f32 %v192_v39, %v437_v0  ;;  %v197_v60 = vmul.f32 %v442_v1, %v196_v40 }
  0x37   :  { %s535_s16 = sld [smem:[#allocation7 + $0x3]]  ;;  %v110_v41 = vstv %s487_s6  ;;  %v124_v42 = vstv %s489_s0  ;;  %s541_s17 = sld [smem:[#allocation6 + $0x7]]  ;;  %v200_v63 = vmul.f32 %v451_v2, %v199_v43  ;;  %v207_v7 = vmul.f32 %v206_v44, %v437_v0 }
  0x38   :  { %v111_v45 = vadd.f32 %v110_v41, %v109_v9  ;;  %v125_v46 = vadd.f32 %v124_v42, %v123_v12  ;;  %v138_v47 = vstv %s495_s7  ;;  %v152_v48 = vstv %s497_s2  ;;  %s545_s18 = sld [smem:[#allocation7 + $0x4]]  ;;  %s549_s19 = sld [smem:[#allocation7 + $0x5]] }
  0x39   :  { %v139_v49 = vadd.f32 %v138_v47, %v137_v25  ;;  %v153_v50 = vadd.f32 %v152_v48, %v151_v30  ;;  %v166_v51 = vstv %s503_s8  ;;  %v180_v52 = vstv %s505_s9  ;;  %s559_s21 = sld [smem:[#allocation7 + $0x6]]  ;;  %s565_s23 = sld [smem:[#allocation7 + $0x7]] }
  0x3a   :  { %v114_v53 = vadd.f32 %v113_v10, %v111_v45  ;;  %v128_v54 = vadd.f32 %v127_v13, %v125_v46  ;;  %v167_v55 = vadd.f32 %v166_v51, %v165_v33  ;;  %v181_v56 = vadd.f32 %v180_v52, %v179_v36  ;;  %s366_s28 = smov [#allocation9]  }
  0x3b   :  { %s93_s20 = sadd.f32 %s521_s13, %s519_s12  ;;  %v142_v57 = vadd.f32 %v141_v26, %v139_v49  ;;  %v156_v58 = vadd.f32 %v155_v31, %v153_v50  ;;  %v210_v3 = vstv %s511_s10  ;;  %v213_v10 = vstv %s513_s11  ;;  %s227_s3 = sshll.u32 %s366_s28, 4  ;;  %s228_s3 = int_to_ptr.vmem [resolvable:$true] %s227_s3 }
  0x3c   :  { %v117_v61 = vadd.f32 %v478_v11, %v114_v53  ;;  %v131_v62 = vadd.f32 %v483_v14, %v128_v54  ;;  %v170_v6 = vadd.f32 %v169_v34, %v167_v55  ;;  %v184_v8 = vadd.f32 %v183_v37, %v181_v56  ;;  %s333_s29 = scalar_lea.vmem %s228_s3, 16  ;;  %s337_s30 = scalar_lea.vmem %s228_s3, 32 }
  0x3d   :  { %s94_s22 = sadd.f32 %s529_s15, %s93_s20  ;;  %v145_v4 = vadd.f32 %v144_v29, %v142_v57  ;;  %v159_v5 = vadd.f32 %v158_v32, %v156_v58  ;;  %v194_v9 = vstv %s527_s14  ;;  %v211_v13 = vmul.f32 %v442_v1, %v210_v3  ;;  %p334_p13 = scmp.ne.s32.totalorder %s228_s3, %s333_s29 }
  0x3e   :  { %283 = vtanh.f32 %v117_v61  ;;  %v173_v11 = vadd.f32 %v172_v35, %v170_v6  ;;  %v195_v12 = vadd.f32 %v194_v9, %v193_v59  ;;  %v187_v14 = vadd.f32 %v186_v38, %v184_v8  ;;  %p338_p0 = scmp.lt.s32.totalorder %s228_s3, %s228_s3  ;;  %p339_p1 = scmp.lt.s32.totalorder %s337_s30, %s333_s29 }
  0x3f   :  { %s95_s24 = sadd.f32 %s535_s16, %s94_s22  ;;  %285 = vtanh.f32 %v131_v62  ;;  %v208_v15 = vstv %s541_s17  ;;  %v214_v17 = vmul.f32 %v451_v2, %v213_v10  ;;  %v119_v20 = vstv %s519_s12 }
  0x40   :  { %287 = vtanh.f32 %v145_v4  ;;  %v198_v0 = vadd.f32 %v197_v60, %v195_v12  ;;  %v209_v16 = vadd.f32 %v208_v15, %v207_v7  ;;  %v133_v21 = vstv %s521_s13  ;;  %p340_p2 = por %p339_p1, %p338_p0 }
  0x41   :  { %s96_s25 = sadd.f32 %s545_s18, %s95_s24  ;;  %289 = vtanh.f32 %v159_v5  ;;  %v147_v23 = vstv %s529_s15  ;;  %v161_v28 = vstv %s535_s16  ;;  %v175_v33 = vstv %s545_s18 }
  0x42   :  { %291 = vtanh.f32 %v173_v11  ;;  %v201_v18 = vadd.f32 %v200_v63, %v198_v0  ;;  %v212_v19 = vadd.f32 %v211_v13, %v209_v16  ;;  %v189_v37 = vstv %s549_s19  ;;  %p341_p3 = pnand %p340_p2, %p334_p13 }
  0x43   :  { %s97_s26 = sadd.f32 %s549_s19, %s96_s25  ;;  %293 = vtanh.f32 %v187_v14  ;;  %v203_v41 = vstv %s559_s21  ;;  %v217_v45 = vstv %s565_s23 }
  0x44   :  { %v215_v1 = vadd.f32 %v214_v17, %v212_v19  ;;  %295 = vtanh.f32 %v201_v18 }
  0x45   :  { %s98_s27 = sadd.f32 %s559_s21, %s97_s26 }
  0x46   :  { %297 = vtanh.f32 %v215_v1 }
  0x47   :  { %s99_s1 = sadd.f32 %s565_s23, %s98_s27 }
  0x48   :  { %v284_v22 = vpop.eup %283 }
  0x49   :  { %v286_v24 = vpop.eup %285  ;;  %v107_v25 = vstv %s99_s1  ;;  %v120_v2 = vmul.f32 %v284_v22, %v119_v20 }
  0x4a   :  { %v288_v26 = vpop.eup %287  ;;  %v134_v27 = vmul.f32 %v286_v24, %v133_v21 }
  0x4b   :  { %v290_v29 = vpop.eup %289  ;;  %v121_v30 = vadd.f32 %v120_v2, %v107_v25  ;;  %v148_v31 = vmul.f32 %v288_v26, %v147_v23 }
  0x4c   :  { %v292_v32 = vpop.eup %291  ;;  %v162_v35 = vmul.f32 %v290_v29, %v161_v28 }
  0x4d   :  { %v135_v34 = vadd.f32 %v134_v27, %v121_v30  ;;  %v294_v36 = vpop.eup %293  ;;  %v176_v39 = vmul.f32 %v292_v32, %v175_v33 }
  0x4e   :  { %v296_v40 = vpop.eup %295  ;;  %v190_v43 = vmul.f32 %v294_v36, %v189_v37 }
  0x4f   :  { %v149_v38 = vadd.f32 %v148_v31, %v135_v34  ;;  %v204_v47 = vmul.f32 %v296_v40, %v203_v41 }
  0x50   :  { %v298_v44 = vpop.eup %297 }
  0x51   :  { %v163_v42 = vadd.f32 %v162_v35, %v149_v38  ;;  %v218_v49 = vmul.f32 %v298_v44, %v217_v45 }
  0x53   :  { %v177_v46 = vadd.f32 %v176_v39, %v163_v42 }
  0x55   :  { %v191_v48 = vadd.f32 %v190_v43, %v177_v46 }
  0x57   :  { %v205_v50 = vadd.f32 %v204_v47, %v191_v48 }
  0x59   :  { %v219_v51 = vadd.f32 %v218_v49, %v205_v50 }
  0x5b   :  { %220 = vst [vmem:[#allocation9] sm:$0x1] %v219_v51 }
  0x5c   :  { %344 = shalt.err (!%p341_p3)
}
  0x5d   :  { %s345_s0 = scalar_lea.hbm %s599_s4, 16 }
  0x5e   :  { %p346_p4 = scmp.ne.s32.totalorder %s599_s4, %s345_s0  ;;  %p349_p5 = scmp.lt.u32.totalorder %s345_s0, %s599_s4 }
  0x60   :  { %p351_p6 = pnand %p349_p5, %p346_p4 }
  0x62   :  { %354 = shalt.err (!%p351_p6)
}
  0x63   :  { %230 = dma.vmem_to_hbm [thread:$0]  %s228_s3, 16, %s599_s4, [#allocation3]  }
  0x64   :  { %361 = dma.done.wait [#allocation3], 16  }
  0x65   :  { %362 = vsyncadd [#allocation3], 4294967280 }
  0x66   :  { %234 = vsyncpa [#allocation3], 1 }
  0x67   :  { %235 = vsyncpa [#allocation4], 1 }
  0x68   :  { %236 = vsyncpa [#allocation5], 1 }
  0x69   :  { %237 = vsyncpa [#allocation8], 1 }

</bundles_post_ra>
